<compile_context>
chip_gen: v5e
topology: v5e:2x2
jax: 0.10.0
libtpu: 0.0.40
codegen_flags: <defaults>
</compile_context>

<pallas_src>
import functools

import jax
import jax.numpy as jnp
from jax.experimental import pallas as pl
from jax.experimental.pallas import tpu as pltpu

H_DIM = 128
LANE = 128
SUBLANE = 8

# h3 tiles are kept VMEM-resident in the fused multi-tile kernel; above this
# size fall back to the 2-pass HBM variant (budget vs v7x's 64 MiB VMEM).
_FUSED_H3_LIMIT_BYTES = 16 * 1024 * 1024


def _round_up(x, m):
    return ((x + m - 1) // m) * m


# ----------------------------------------------------------------------------
# Shared kernel pieces.
# ----------------------------------------------------------------------------
def _mlp_body(x_ref, w1_ref, b1_ref, w2_ref, b2_ref, w3_ref, b3_ref):
    """fc1+relu, fc2+relu, fc3.  Matmuls run in the weights' dtype (f32 or
    bf16) with f32 accumulation; bias adds / relu stay f32."""
    cd = w1_ref.dtype
    h1 = jnp.dot(x_ref[...], w1_ref[...], preferred_element_type=jnp.float32)
    h1 = jnp.maximum(h1 + b1_ref[...], 0.0)
    h2 = jnp.dot(h1.astype(cd), w2_ref[...], preferred_element_type=jnp.float32)
    h2 = jnp.maximum(h2 + b2_ref[...], 0.0)
    h3 = jnp.dot(h2.astype(cd), w3_ref[...], preferred_element_type=jnp.float32)
    return h3 + b3_ref[...]


def _partial_sumsq(h3, row0, batch, need_mask):
    """Per-tile sum-of-squares, shape (1, A_pad).  Zero-padded batch rows are
    masked out so they do not contribute to the global norm."""
    if need_mask:
        row = jax.lax.broadcasted_iota(jnp.int32, h3.shape, 0) + row0
        h3 = jnp.where(row < batch, h3, 0.0)
    return jnp.sum(h3 * h3, axis=0, keepdims=True)


def _scale_from_sumsq(sq_row):
    """scale = 10 * tanh(norm) / norm (safe at norm == 0), shape (1, 1)."""
    sq = jnp.sum(sq_row, axis=1, keepdims=True)
    norm = jnp.sqrt(sq)
    inv = jax.lax.rsqrt(jnp.maximum(sq, jnp.float32(1e-30)))
    return jnp.where(sq > 0.0, 10.0 * jnp.tanh(norm) * inv, jnp.float32(10.0))


def _weight_specs(o_dim, h2x, h, a_pad):
    # Constant index_maps -> weights/biases stay VMEM-resident (no re-DMA).
    const = lambda *_: (0, 0)
    return [
        pl.BlockSpec((o_dim, h2x), const),   # w1
        pl.BlockSpec((1, h2x), const),       # b1
        pl.BlockSpec((h2x, h), const),       # w2
        pl.BlockSpec((1, h), const),         # b2
        pl.BlockSpec((h, a_pad), const),     # w3 (lane-padded)
        pl.BlockSpec((1, a_pad), const),     # b3 (lane-padded)
    ]


# ----------------------------------------------------------------------------
# Kernel 1: fully fused single-tile fast path (no grid).
# ----------------------------------------------------------------------------
def actor_fused_kernel(x_ref, w1_ref, b1_ref, w2_ref, b2_ref, w3_ref, b3_ref,
                       o_ref, *, batch, need_mask):
    h3 = _mlp_body(x_ref, w1_ref, b1_ref, w2_ref, b2_ref, w3_ref, b3_ref)
    scale = _scale_from_sumsq(_partial_sumsq(h3, 0, batch, need_mask))
    o_ref[...] = (h3 * scale).astype(o_ref.dtype)


# ----------------------------------------------------------------------------
# Kernel 2: fused two-phase multi-tile kernel, grid = (2, n_tiles).
#   phase 0: MLP per tile -> h3 into VMEM scratch, accumulate sum-of-squares.
#   phase 1: apply the global scale from the VMEM-resident h3.
# ----------------------------------------------------------------------------
def actor_two_phase_kernel(x_ref, w1_ref, b1_ref, w2_ref, b2_ref, w3_ref,
                           b3_ref, o_ref, h3_acc, sq_acc,
                           *, batch, block_b, need_mask):
    phase = pl.program_id(0)
    tile = pl.program_id(1)

    @pl.when(phase == 0)
    def _():
        @pl.when(tile == 0)
        def _():
            sq_acc[...] = jnp.zeros_like(sq_acc)

        h3 = _mlp_body(x_ref, w1_ref, b1_ref, w2_ref, b2_ref, w3_ref, b3_ref)
        h3_acc[tile] = h3
        sq_acc[...] += _partial_sumsq(h3, tile * block_b, batch, need_mask)
        # Keep the (revisited) output block deterministic; phase 1 overwrites.
        o_ref[...] = h3.astype(o_ref.dtype)

    @pl.when(phase == 1)
    def _():
        scale = _scale_from_sumsq(sq_acc[...])       # few XLU/EUP ops per tile
        o_ref[...] = (h3_acc[tile] * scale).astype(o_ref.dtype)


# ----------------------------------------------------------------------------
# Kernels 3a/3b: 2-pass fallback for very large batches (h3 lives in HBM).
# ----------------------------------------------------------------------------
def mlp_pass_kernel(x_ref, w1_ref, b1_ref, w2_ref, b2_ref, w3_ref, b3_ref,
                    h3_ref, sq_ref, *, batch, block_b, need_mask):
    h3 = _mlp_body(x_ref, w1_ref, b1_ref, w2_ref, b2_ref, w3_ref, b3_ref)
    h3_ref[...] = h3.astype(h3_ref.dtype)
    part = _partial_sumsq(h3, pl.program_id(0) * block_b, batch, need_mask)
    sub = jax.lax.broadcasted_iota(jnp.int32, sq_ref.shape, 0)
    sq_ref[...] = jnp.where(sub == 0, part, 0.0)


def scale_pass_kernel(sq_ref, h3_ref, o_ref):
    # Finalize folded in-kernel: reduce partials + tanh + rsqrt (EUP), then
    # scale the tile.  sq_ref is a small VMEM-resident input.
    scale = _scale_from_sumsq(jnp.sum(sq_ref[...], axis=0, keepdims=True))
    o_ref[...] = (h3_ref[...] * scale).astype(o_ref.dtype)


# ----------------------------------------------------------------------------
# One-time parameter preparation (do this at init, not per call).
# ----------------------------------------------------------------------------
def prepare_params(params, compute_dtype=jnp.float32):
    """Lane-pad fc3 to a multiple of 128 output lanes and cast matmul weights
    to `compute_dtype` (f32 default; bf16 feeds the MXU at full rate).
    Biases stay f32 (bias add / relu / norm are f32)."""
    w1, b1, w2, b2, w3, b3 = params
    a_dim = w3.shape[1]
    a_pad = _round_up(max(a_dim, LANE), LANE)
    cd, f32 = compute_dtype, jnp.float32
    w3_p = jnp.zeros((w3.shape[0], a_pad), cd).at[:, :a_dim].set(w3.astype(cd))
    b3_p = jnp.zeros((1, a_pad), f32).at[:, :a_dim].set(b3.astype(f32))
    prep = (w1.astype(cd), b1.astype(f32).reshape(1, -1),
            w2.astype(cd), b2.astype(f32).reshape(1, -1), w3_p, b3_p)
    return prep, a_dim


# ----------------------------------------------------------------------------
# Jitted forward.
# ----------------------------------------------------------------------------
@functools.partial(jax.jit, static_argnames=("a_dim", "block_b"))
def actor_forward(state, prep, *, a_dim, block_b=1024):
    w1, b1, w2, b2, w3_p, b3_p = prep
    cd = w1.dtype
    f32 = jnp.float32
    B, o_dim = state.shape
    h2x = w1.shape[1]
    h = w2.shape[1]
    a_pad = w3_p.shape[1]

    # Batch tiling: rows aligned so sub-32-bit x tiles stay (16,128)-friendly.
    row_align = SUBLANE * max(1, 4 // jnp.dtype(cd).itemsize)
    TB = _round_up(min(block_b, _round_up(B, row_align)), row_align)
    n_tiles = -(-B // TB)
    fused_multi = n_tiles * TB * a_pad * 4 <= _FUSED_H3_LIMIT_BYTES
    if n_tiles > 1 and not fused_multi and n_tiles % 2 == 1:
        # Fallback path shards the tile axis across v7x's 2 TensorCores:
        # keep the tile count even for balanced work.
        n_tiles += 1
        TB = _round_up(-(-B // n_tiles), row_align)
    B_pad = n_tiles * TB
    need_mask = B_pad != B

    # Only the per-call state pad/cast stays in the wrapper.
    x = state.astype(cd)
    if need_mask:
        x = jnp.zeros((B_pad, o_dim), cd).at[:B, :].set(x)

    flops = 2 * B_pad * (o_dim * h2x + h2x * h + h * a_pad)
    in_bytes = (x.size * x.dtype.itemsize
                + sum(a.size * a.dtype.itemsize for a in prep))

    # ---- Path A: fully fused single-tile fast path (deployment shape). ----
    if n_tiles == 1:
        out_full = pl.pallas_call(
            functools.partial(actor_fused_kernel, batch=B,
                              need_mask=need_mask),
            out_shape=jax.ShapeDtypeStruct((B_pad, a_pad), f32),
            cost_estimate=pl.CostEstimate(
                flops=flops, transcendentals=1,
                bytes_accessed=in_bytes + B_pad * a_pad * 4),
        )(x, w1, b1, w2, b2, w3_p, b3_p)
        return out_full[:B, :a_dim]

    w_specs = _weight_specs(o_dim, h2x, h, a_pad)

    # ---- Path B: fused two-phase kernel, h3 stays VMEM-resident. ----
    if fused_multi:
        out_full = pl.pallas_call(
            functools.partial(actor_two_phase_kernel, batch=B, block_b=TB,
                              need_mask=need_mask),
            out_shape=jax.ShapeDtypeStruct((B_pad, a_pad), f32),
            grid=(2, n_tiles),
            in_specs=[pl.BlockSpec((TB, o_dim), lambda p, t: (t, 0))] + w_specs,
            out_specs=pl.BlockSpec((TB, a_pad), lambda p, t: (t, 0)),
            scratch_shapes=[pltpu.VMEM((n_tiles, TB, a_pad), f32),
                            pltpu.VMEM((1, a_pad), f32)],
            compiler_params=pltpu.CompilerParams(
                # Shared h3/sum-of-squares scratch across tiles -> both axes
                # must be sequential (no megacore sharding on v7x).
                dimension_semantics=("arbitrary", "arbitrary")),
            cost_estimate=pl.CostEstimate(
                flops=flops, transcendentals=n_tiles,
                bytes_accessed=in_bytes + 2 * B_pad * a_pad * 4),
        )(x, w1, b1, w2, b2, w3_p, b3_p)
        return out_full[:B, :a_dim]

    # ---- Path C: very large batch fallback (2 passes, h3 in HBM). ----
    h3_full, partials = pl.pallas_call(
        functools.partial(mlp_pass_kernel, batch=B, block_b=TB,
                          need_mask=need_mask),
        out_shape=(jax.ShapeDtypeStruct((B_pad, a_pad), f32),
                   jax.ShapeDtypeStruct((n_tiles * SUBLANE, a_pad), f32)),
        grid=(n_tiles,),
        in_specs=[pl.BlockSpec((TB, o_dim), lambda i: (i, 0))] + w_specs,
        out_specs=(pl.BlockSpec((TB, a_pad), lambda i: (i, 0)),
                   pl.BlockSpec((SUBLANE, a_pad), lambda i: (i, 0))),
        compiler_params=pltpu.CompilerParams(
            dimension_semantics=("parallel",)),
        cost_estimate=pl.CostEstimate(
            flops=flops, transcendentals=0,
            bytes_accessed=in_bytes + B_pad * a_pad * 4),
    )(x, w1, b1, w2, b2, w3_p, b3_p)

    out_full = pl.pallas_call(
        scale_pass_kernel,
        out_shape=jax.ShapeDtypeStruct((B_pad, a_pad), f32),
        grid=(n_tiles,),
        in_specs=[pl.BlockSpec((n_tiles * SUBLANE, a_pad), lambda i: (0, 0)),
                  pl.BlockSpec((TB, a_pad), lambda i: (i, 0))],
        out_specs=pl.BlockSpec((TB, a_pad), lambda i: (i, 0)),
        input_output_aliases={1: 0},     # reuse h3_full's buffer for the output
        compiler_params=pltpu.CompilerParams(
            dimension_semantics=("parallel",)),
    )(partials, h3_full)
    return out_full[:B, :a_dim]


# ----------------------------------------------------------------------------
# Init mirroring the PyTorch module's reset_parameters().
# Weights are stored transposed vs. PyTorch: (in_features, out_features).
# Note hidden_init uses weight.size()[0] == out_features (PyTorch-code quirk).
# ----------------------------------------------------------------------------
def init_actor_params(key, o_dim, a_dim):
    k = jax.random.split(key, 6)
    h2x, h = H_DIM * 2, H_DIM

    lim1 = 1.0 / jnp.sqrt(jnp.float32(h2x))
    lim2 = 1.0 / jnp.sqrt(jnp.float32(h))
    lim3 = 3e-3

    w1 = jax.random.uniform(k[0], (o_dim, h2x), jnp.float32, -lim1, lim1)
    b1 = jax.random.uniform(k[1], (1, h2x), jnp.float32,
                            -1.0 / jnp.sqrt(jnp.float32(o_dim)),
                            1.0 / jnp.sqrt(jnp.float32(o_dim)))
    w2 = jax.random.uniform(k[2], (h2x, h), jnp.float32, -lim2, lim2)
    b2 = jax.random.uniform(k[3], (1, h), jnp.float32,
                            -1.0 / jnp.sqrt(jnp.float32(h2x)),
                            1.0 / jnp.sqrt(jnp.float32(h2x)))
    w3 = jax.random.uniform(k[4], (h, a_dim), jnp.float32, -lim3, lim3)
    b3 = jax.random.uniform(k[5], (1, a_dim), jnp.float32,
                            -1.0 / jnp.sqrt(jnp.float32(h)),
                            1.0 / jnp.sqrt(jnp.float32(h)))
    return (w1, b1, w2, b2, w3, b3)


def actor_reference(state, params):
    """Pure-JAX reference matching the PyTorch forward."""
    w1, b1, w2, b2, w3, b3 = params
    h1 = jnp.maximum(state @ w1 + b1, 0.0)
    h2 = jnp.maximum(h1 @ w2 + b2, 0.0)
    h3 = h2 @ w3 + b3
    norm = jnp.linalg.norm(h3)
    return jnp.where(norm > 0.0, 10.0 * jnp.tanh(norm) * h3 / norm, 10.0 * h3)


if __name__ == "__main__":
    key = jax.random.PRNGKey(0)
    k_param, k_state, k_state2 = jax.random.split(key, 3)

    o_dim, a_dim = 16, 4
    params = init_actor_params(k_param, o_dim, a_dim)

    # One-time weight prep (f32 path for exact parity with the reference).
    prep_f32, a = prepare_params(params)

    # Deployment shape: single-tile fully fused kernel.
    state = jax.random.normal(k_state, (2, o_dim), jnp.float32)
    out = jax.block_until_ready(actor_forward(state, prep_f32, a_dim=a))
    ref = actor_reference(state, params)
    assert out.shape == (2, a_dim)
    assert jnp.allclose(out, ref, atol=1e-5, rtol=1e-5), (out, ref)

    # Larger batch with small tiles: fused two-phase kernel, batch padding +
    # masked global norm.
    state2 = jax.random.normal(k_state2, (300, o_dim), jnp.float32)
    out2 = jax.block_until_ready(
        actor_forward(state2, prep_f32, a_dim=a, block_b=128))
    ref2 = actor_reference(state2, params)
    assert out2.shape == (300, a_dim)
    assert jnp.allclose(out2, ref2, atol=1e-4, rtol=1e-4)

    # bf16 MXU path (weights prepared once in bf16; loose tolerance vs f32).
    prep_bf16, _ = prepare_params(params, compute_dtype=jnp.bfloat16)
    out3 = jax.block_until_ready(actor_forward(state, prep_bf16, a_dim=a))
    assert out3.shape == (2, a_dim)
    assert jnp.allclose(out3, ref, atol=5e-2, rtol=5e-2)

    print("KERNEL_OK")
</pallas_src>

<mosaic_0001>
module attributes {stable_mosaic.version = 11 : i64} {
  func.func @actor_fused_kernel(%arg0: memref<8x16xf32, #tpu.memory_space<vmem>>, %arg1: memref<16x256xf32, #tpu.memory_space<vmem>>, %arg2: memref<1x256xf32, #tpu.memory_space<vmem>>, %arg3: memref<256x128xf32, #tpu.memory_space<vmem>>, %arg4: memref<1x128xf32, #tpu.memory_space<vmem>>, %arg5: memref<128x128xf32, #tpu.memory_space<vmem>>, %arg6: memref<1x128xf32, #tpu.memory_space<vmem>>, %arg7: memref<8x128xf32, #tpu.memory_space<vmem>>) attributes {dimension_semantics = [], scalar_prefetch = 0 : i64, scratch_operands = 0 : i64, tpu.core_type = #tpu.core_type<tc>} {
    %c0 = arith.constant 0 : index
    %c0_0 = arith.constant 0 : index
    %0 = vector.load %arg0[%c0, %c0_0] : memref<8x16xf32, #tpu.memory_space<vmem>>, vector<8x16xf32>
    %c0_1 = arith.constant 0 : index
    %c0_2 = arith.constant 0 : index
    %1 = vector.load %arg1[%c0_1, %c0_2] : memref<16x256xf32, #tpu.memory_space<vmem>>, vector<16x256xf32>
    %cst = arith.constant dense<0.000000e+00> : vector<8x256xf32>
    %2 = tpu.matmul %0, %1, %cst {dimension_numbers = #tpu.dot_dimension_numbers<[1], [0], [0], [1], [0, 0, 1, 1], [], []>} : vector<8x16xf32>, vector<16x256xf32>, vector<8x256xf32> -> vector<8x256xf32>
    %c0_3 = arith.constant 0 : index
    %c0_4 = arith.constant 0 : index
    %3 = vector.load %arg2[%c0_3, %c0_4] : memref<1x256xf32, #tpu.memory_space<vmem>>, vector<1x256xf32>
    %4 = vector.broadcast %3 : vector<1x256xf32> to vector<8x256xf32>
    %5 = arith.addf %2, %4 : vector<8x256xf32>
    %cst_5 = arith.constant 0.000000e+00 : f32
    %6 = vector.broadcast %cst_5 : f32 to vector<8x256xf32>
    %7 = arith.maximumf %5, %6 : vector<8x256xf32>
    %c0_6 = arith.constant 0 : index
    %c0_7 = arith.constant 0 : index
    %8 = vector.load %arg3[%c0_6, %c0_7] : memref<256x128xf32, #tpu.memory_space<vmem>>, vector<256x128xf32>
    %cst_8 = arith.constant dense<0.000000e+00> : vector<8x128xf32>
    %9 = tpu.matmul %7, %8, %cst_8 {dimension_numbers = #tpu.dot_dimension_numbers<[1], [0], [0], [1], [0, 0, 1, 1], [], []>} : vector<8x256xf32>, vector<256x128xf32>, vector<8x128xf32> -> vector<8x128xf32>
    %c0_9 = arith.constant 0 : index
    %c0_10 = arith.constant 0 : index
    %10 = vector.load %arg4[%c0_9, %c0_10] : memref<1x128xf32, #tpu.memory_space<vmem>>, vector<1x128xf32>
    %11 = vector.broadcast %10 : vector<1x128xf32> to vector<8x128xf32>
    %12 = arith.addf %9, %11 : vector<8x128xf32>
    %cst_11 = arith.constant 0.000000e+00 : f32
    %13 = vector.broadcast %cst_11 : f32 to vector<8x128xf32>
    %14 = arith.maximumf %12, %13 : vector<8x128xf32>
    %c0_12 = arith.constant 0 : index
    %c0_13 = arith.constant 0 : index
    %15 = vector.load %arg5[%c0_12, %c0_13] : memref<128x128xf32, #tpu.memory_space<vmem>>, vector<128x128xf32>
    %cst_14 = arith.constant dense<0.000000e+00> : vector<8x128xf32>
    %16 = tpu.matmul %14, %15, %cst_14 {dimension_numbers = #tpu.dot_dimension_numbers<[1], [0], [0], [1], [0, 0, 1, 1], [], []>} : vector<8x128xf32>, vector<128x128xf32>, vector<8x128xf32> -> vector<8x128xf32>
    %c0_15 = arith.constant 0 : index
    %c0_16 = arith.constant 0 : index
    %17 = vector.load %arg6[%c0_15, %c0_16] : memref<1x128xf32, #tpu.memory_space<vmem>>, vector<1x128xf32>
    %18 = vector.broadcast %17 : vector<1x128xf32> to vector<8x128xf32>
    %19 = arith.addf %16, %18 : vector<8x128xf32>
    %20 = tpu.iota {dimensions = array<i32: 0>} : vector<8x128xi32>
    %c0_i32 = arith.constant 0 : i32
    %21 = vector.broadcast %c0_i32 : i32 to vector<8x128xi32>
    %22 = arith.addi %20, %21 : vector<8x128xi32>
    %c2_i32 = arith.constant 2 : i32
    %23 = vector.broadcast %c2_i32 : i32 to vector<8x128xi32>
    %24 = arith.cmpi slt, %22, %23 : vector<8x128xi32>
    %cst_17 = arith.constant 0.000000e+00 : f32
    %25 = vector.broadcast %cst_17 : f32 to vector<8x128xf32>
    %26 = arith.select %24, %19, %25 : vector<8x128xi1>, vector<8x128xf32>
    %27 = arith.mulf %26, %26 : vector<8x128xf32>
    %cst_18 = arith.constant dense<0.000000e+00> : vector<128xf32>
    %28 = vector.multi_reduction <add>, %27, %cst_18 [0] : vector<8x128xf32> to vector<128xf32>
    %29 = vector.shape_cast %28 : vector<128xf32> to vector<1x128xf32>
    %cst_19 = arith.constant dense<0.000000e+00> : vector<1xf32>
    %30 = vector.multi_reduction <add>, %29, %cst_19 [1] : vector<1x128xf32> to vector<1xf32>
    %31 = vector.shape_cast %30 : vector<1xf32> to vector<1x1xf32>
    %32 = math.sqrt %31 : vector<1x1xf32>
    %cst_20 = arith.constant 1.000000e-30 : f32
    %33 = vector.broadcast %cst_20 : f32 to vector<1x1xf32>
    %34 = arith.maximumf %31, %33 : vector<1x1xf32>
    %35 = math.rsqrt %34 : vector<1x1xf32>
    %cst_21 = arith.constant 0.000000e+00 : f32
    %36 = vector.broadcast %cst_21 : f32 to vector<1x1xf32>
    %37 = arith.cmpf ogt, %31, %36 : vector<1x1xf32>
    %38 = math.tanh %32 : vector<1x1xf32>
    %cst_22 = arith.constant 1.000000e+01 : f32
    %39 = vector.broadcast %cst_22 : f32 to vector<1x1xf32>
    %40 = arith.mulf %39, %38 : vector<1x1xf32>
    %41 = arith.mulf %40, %35 : vector<1x1xf32>
    %cst_23 = arith.constant 1.000000e+01 : f32
    %42 = vector.broadcast %cst_23 : f32 to vector<1x1xf32>
    %43 = arith.select %37, %41, %42 : vector<1x1xi1>, vector<1x1xf32>
    %44 = vector.broadcast %43 : vector<1x1xf32> to vector<8x128xf32>
    %45 = arith.mulf %19, %44 : vector<8x128xf32>
    %c0_24 = arith.constant 0 : index
    %c0_25 = arith.constant 0 : index
    %46 = vector.load %arg7[%c0_24, %c0_25] : memref<8x128xf32, #tpu.memory_space<vmem>>, vector<8x128xf32>
    tpu.vector_store %arg7[%c0_24, %c0_25], %45 {strides = array<i32>} : memref<8x128xf32, #tpu.memory_space<vmem>>, vector<8x128xf32>,
    return
  }
}

</mosaic_0001>

<bundles_post_ra>
// kernel: actor_forward.1
= control target key start
LH: loop header
LB: loop body
LE: loop exit
PB: predicated region body
PF: predicated region fallthrough
CT: control target
= control target key end

     0   :  { %12 = vsyncpa [#allocation3], 0  ;;  %s462_s0 = inlined_call_operand.vmem [shape: f32[8,16], index: 0, kind: input, shape index: {}]   ;;  %s463_s1 = inlined_call_operand.hbm [shape: f32[16,256], index: 1, kind: input, shape index: {}]   ;;  %s464_s2 = inlined_call_operand.vmem [shape: f32[1,256], index: 2, kind: input, shape index: {}]   ;;  %s465_s3 = inlined_call_operand.hbm [shape: f32[256,128], index: 3, kind: input, shape index: {}]   ;;  %s466_s4 = inlined_call_operand.vmem [shape: f32[1,128], index: 4, kind: input, shape index: {}]   ;;  %s467_s5 = inlined_call_operand.hbm [shape: f32[128,128], index: 5, kind: input, shape index: {}]   ;;  %s468_s6 = inlined_call_operand.vmem [shape: f32[1,128], index: 6, kind: input, shape index: {}]   ;;  %s469_s7 = inlined_call_operand.vmem [shape: f32[8,128], index: 7, kind: output, shape index: {}]  }
   0x1   :  { %13 = vsyncpa [#allocation5], 0  ;;  %s35_s26 = sshll.u32 %s465_s3, 4  ;;  %s389_s27 = smov [#allocation4]   ;;  %s36_s26 = int_to_ptr.hbm [resolvable:$true] %s35_s26 }
   0x2   :  { %s37_s28 = sshll.u32 %s389_s27, 4  ;;  %s20_s8 = sshll.u32 %s463_s1, 4  ;;  %s38_s28 = int_to_ptr.vmem [resolvable:$true] %s37_s28  ;;  %s21_s8 = int_to_ptr.hbm [resolvable:$true] %s20_s8 }
   0x3   :  { %s390_s9 = smov 128   ;;  %s391_s10 = smov 8  }
   0x4   :  { %43 = dma.hbm_to_vmem [thread:$0]  %s36_s26, 4096, %s38_s28, [#allocation5], %s390_s9, %s390_s9, %s391_s10  }
   0x5   :  { %s392_s11 = smov [#allocation2]   ;;  %s393_s13 = smov 256  }
   0x6   :  { %s22_s12 = sshll.u32 %s392_s11, 4  ;;  %s394_s14 = smov 16   ;;  %s23_s12 = int_to_ptr.vmem [resolvable:$true] %s22_s12 }
   0x7   :  { %28 = dma.hbm_to_vmem [thread:$0]  %s21_s8, 512, %s23_s12, [#allocation3], %s393_s13, %s393_s13, %s394_s14  }
   0x8   :  { %s50_s16 = sshll.u32 %s467_s5, 4  ;;  %s395_s17 = smov [#allocation6]   ;;  %s51_s16 = int_to_ptr.hbm [resolvable:$true] %s50_s16 }
   0x9   :  { %s52_s18 = sshll.u32 %s395_s17, 4  ;;  %s53_s18 = int_to_ptr.vmem [resolvable:$true] %s52_s18 }
   0xa   :  { %58 = dma.hbm_to_vmem [thread:$0]  %s51_s16, 2048, %s53_s18, [#allocation5], %s390_s9, %s390_s9, %s391_s10  }
   0xb   :  { %385 = dma.done.wait [#allocation3], 512  }
   0xc   :  { %386 = vsyncadd [#allocation3], 4294966784 }
   0xd   :  { %387 = dma.done.wait [#allocation5], 6144  }
   0xe   :  { %388 = vsyncadd [#allocation5], 4294961152  ;;  %v76_v0 = vld [vmem:[#allocation2 + $0x10] sm:$0xff]  ;;  %v74_v1 = vld [vmem:[#allocation2] sm:$0xff]  ;;  %vm84_vm0 = vcmask 130048  }
   0xf   :  { %102 = vmatpush.msra.mxu1 %v76_v0  ;;  %v73_v2 = vld [vmem:[%s462_s0] sm:$0xff]  ;;  %v145_v3 = vld [vmem:[#allocation4 + $0x78] sm:$0xff]  ;;  %v144_v5 = vld [vmem:[#allocation4 + $0x70] sm:$0xff] }
  0x10   :  { %v77_v4 = vld [vmem:[#allocation2 + $0x18] sm:$0xff]  ;;  %166 = vmatpush.msra.mxu2 %v145_v3  ;;  %v143_v6 = vld [vmem:[#allocation4 + $0x68] sm:$0xff]  ;;  %v160_v9 = vld [vmem:[#allocation4 + $0xf0] sm:$0xff] }
  0x11   :  { %103 = vmatpush.msra.mxu1 %v74_v1  ;;  %v161_v7 = vld [vmem:[#allocation4 + $0xf8] sm:$0xff]  ;;  %v75_v8 = vld [vmem:[#allocation2 + $0x8] sm:$0xff]  ;;  %v142_v10 = vld [vmem:[#allocation4 + $0x60] sm:$0xff] }
  0x12   :  { %296 = vmatmul.msk.f32.vlgmr.msra.gmra.mxu1 %vm84_vm0, %v73_v2  ;;  %167 = vmatpush.msra.mxu2 %v144_v5  ;;  %v159_v11 = vld [vmem:[#allocation4 + $0xe8] sm:$0xff]  ;;  %v141_v12 = vld [vmem:[#allocation4 + $0x58] sm:$0xff]  ;;  %v158_v13 = vld [vmem:[#allocation4 + $0xe0] sm:$0xff] }
  0x13   :  { %122 = vmatpush.msrb.mxu1 %v77_v4  ;;  %186 = vmatpush.msra.mxu3 %v161_v7  ;;  %v140_v14 = vld [vmem:[#allocation4 + $0x50] sm:$0xff]  ;;  %v157_v15 = vld [vmem:[#allocation4 + $0xd8] sm:$0xff]  ;;  %v139_v16 = vld [vmem:[#allocation4 + $0x48] sm:$0xff]  ;;  %v247_v4 = vlaneseq }
  0x14   :  { %168 = vmatpush.msra.mxu2 %v143_v6  ;;  %v156_v17 = vld [vmem:[#allocation4 + $0xd0] sm:$0xff]  ;;  %v138_v18 = vld [vmem:[#allocation4 + $0x40] sm:$0xff]  ;;  %v155_v19 = vld [vmem:[#allocation4 + $0xc8] sm:$0xff] }
  0x15   :  { %123 = vmatpush.msrb.mxu1 %v75_v8  ;;  %187 = vmatpush.msra.mxu3 %v160_v9  ;;  %v137_v20 = vld [vmem:[#allocation4 + $0x38] sm:$0xff]  ;;  %v154_v21 = vld [vmem:[#allocation4 + $0xc0] sm:$0xff]  ;;  %v136_v22 = vld [vmem:[#allocation4 + $0x30] sm:$0xff]  ;;  %v248_v5 = vshrl.u32 %v247_v4, 7 }
  0x16   :  { %169 = vmatpush.msra.mxu2 %v142_v10  ;;  %v153_v23 = vld [vmem:[#allocation4 + $0xb8] sm:$0xff]  ;;  %v135_v24 = vld [vmem:[#allocation4 + $0x28] sm:$0xff]  ;;  %v134_v25 = vld [vmem:[#allocation4 + $0x20] sm:$0xff] }
  0x17   :  { %188 = vmatpush.msra.mxu3 %v159_v11  ;;  %v133_v26 = vld [vmem:[#allocation4 + $0x18] sm:$0xff]  ;;  %v132_v27 = vld [vmem:[#allocation4 + $0x10] sm:$0xff]  ;;  %v131_v29 = vld [vmem:[#allocation4 + $0x8] sm:$0xff]  ;;  %vm249_vm1 = vcmp.lt.s32.totalorder %v248_v5, 2 }
  0x18   :  { %170 = vmatpush.msra.mxu2 %v141_v12  ;;  %v152_v28 = vld [vmem:[#allocation4 + $0xb0] sm:$0xff]  ;;  %v151_v30 = vld [vmem:[#allocation4 + $0xa8] sm:$0xff]  ;;  %v130_v31 = vld [vmem:[#allocation4] sm:$0xff] }
  0x19   :  { %189 = vmatpush.msra.mxu3 %v158_v13  ;;  %v150_v32 = vld [vmem:[#allocation4 + $0xa0] sm:$0xff]  ;;  %v149_v33 = vld [vmem:[#allocation4 + $0x98] sm:$0xff]  ;;  %v148_v34 = vld [vmem:[#allocation4 + $0x90] sm:$0xff] }
  0x1a   :  { %297 = vmatmul.msk.f32.vlgmr.msrb.gmra.mxu1 %vm84_vm0, %v73_v2  ;;  %171 = vmatpush.msra.mxu2 %v140_v14  ;;  %v147_v35 = vld [vmem:[#allocation4 + $0x88] sm:$0xff]  ;;  %v146_v36 = vld [vmem:[#allocation4 + $0x80] sm:$0xff]  ;;  %v222_v37 = vld [vmem:[#allocation6 + $0x78] sm:$0xff] }
  0x1b   :  { %190 = vmatpush.msra.mxu3 %v157_v15  ;;  %v221_v38 = vld [vmem:[#allocation6 + $0x70] sm:$0xff]  ;;  %227 = vmatpush.msra.mxu0 %v222_v37  ;;  %v220_v39 = vld [vmem:[#allocation6 + $0x68] sm:$0xff]  ;;  %v219_v40 = vld [vmem:[#allocation6 + $0x60] sm:$0xff] }
  0x1c   :  { %172 = vmatpush.msra.mxu2 %v139_v16  ;;  %v218_v41 = vld [vmem:[#allocation6 + $0x58] sm:$0xff]  ;;  %v217_v42 = vld [vmem:[#allocation6 + $0x50] sm:$0xff]  ;;  %v216_v43 = vld [vmem:[#allocation6 + $0x48] sm:$0xff] }
  0x1d   :  { %191 = vmatpush.msra.mxu3 %v156_v17  ;;  %228 = vmatpush.msra.mxu0 %v221_v38  ;;  %v215_v44 = vld [vmem:[#allocation6 + $0x40] sm:$0xff]  ;;  %v214_v46 = vld [vmem:[#allocation6 + $0x38] sm:$0xff]  ;;  %v213_v55 = vld [vmem:[#allocation6 + $0x30] sm:$0xff] }
  0x1e   :  { %173 = vmatpush.msra.mxu2 %v138_v18  ;;  %v78_v45 = vld [vmem:[%s464_s2] sm:$0x3]  ;;  %v212_v56 = vld [vmem:[#allocation6 + $0x28] sm:$0xff]  ;;  %v210_v58 = vld [vmem:[#allocation6 + $0x18] sm:$0xff] }
  0x1f   :  { %192 = vmatpush.msra.mxu3 %v155_v19  ;;  %229 = vmatpush.msra.mxu0 %v220_v39  ;;  %v80_v47 = vperm.slane %v78_v45, 0  ;;  %v81_v51 = vperm.slane %v78_v45, 1  ;;  %v211_v57 = vld [vmem:[#allocation6 + $0x20] sm:$0xff]  ;;  %v209_v59 = vld [vmem:[#allocation6 + $0x10] sm:$0xff]  ;;  %v208_v60 = vld [vmem:[#allocation6 + $0x8] sm:$0xff] }
  0x20   :  { %174 = vmatpush.msra.mxu2 %v137_v20  ;;  %v207_v61 = vld [vmem:[#allocation6] sm:$0xff] }
  0x21   :  { %193 = vmatpush.msra.mxu3 %v154_v21  ;;  %230 = vmatpush.msra.mxu0 %v219_v40  ;;  %v305_v62 = vld [vmem:[%s466_s4] ss:$0 sm:$0xff] }
  0x22   :  { %175 = vmatpush.msra.mxu2 %v136_v22  ;;  %v306_v6 = vld [vmem:[%s468_s6] ss:$0 sm:$0xff] }
  0x23   :  { %194 = vmatpush.msra.mxu3 %v153_v23  ;;  %231 = vmatpush.msra.mxu0 %v218_v41 }
  0x24   :  { %176 = vmatpush.msra.mxu2 %v135_v24 }
  0x25   :  { %195 = vmatpush.msra.mxu3 %v152_v28  ;;  %232 = vmatpush.msra.mxu0 %v217_v42 }
  0x26   :  { %177 = vmatpush.msra.mxu2 %v134_v25 }
  0x27   :  { %196 = vmatpush.msra.mxu3 %v151_v30  ;;  %233 = vmatpush.msra.mxu0 %v216_v43 }
  0x28   :  { %178 = vmatpush.msra.mxu2 %v133_v26 }
  0x29   :  { %197 = vmatpush.msra.mxu3 %v150_v32  ;;  %234 = vmatpush.msra.mxu0 %v215_v44 }
  0x2a   :  { %179 = vmatpush.msra.mxu2 %v132_v27 }
  0x2b   :  { %198 = vmatpush.msra.mxu3 %v149_v33  ;;  %235 = vmatpush.msra.mxu0 %v214_v46 }
  0x2c   :  { %180 = vmatpush.msra.mxu2 %v131_v29 }
  0x2d   :  { %199 = vmatpush.msra.mxu3 %v148_v34  ;;  %236 = vmatpush.msra.mxu0 %v213_v55 }
  0x2e   :  { %181 = vmatpush.msra.mxu2 %v130_v31 }
  0x2f   :  { %200 = vmatpush.msra.mxu3 %v147_v35  ;;  %237 = vmatpush.msra.mxu0 %v212_v56 }
  0x31   :  { %201 = vmatpush.msra.mxu3 %v146_v36  ;;  %238 = vmatpush.msra.mxu0 %v211_v57 }
  0x33   :  { %239 = vmatpush.msra.mxu0 %v210_v58 }
  0x35   :  { %240 = vmatpush.msra.mxu0 %v209_v59 }
  0x37   :  { %241 = vmatpush.msra.mxu0 %v208_v60 }
  0x39   :  { %242 = vmatpush.msra.mxu0 %v207_v61 }
  0x8f   :  { %v105_v48 = vpop.f32.mrf.mxu1 }
  0x90   :  { %v106_v49 = vadd.f32 %v105_v48, %v80_v47 }
  0x92   :  { %v128_v50 = vmax.f32 %v106_v49, 0.0 }
  0x94   :  { %182 = vmatmul.f32.vlgmr.msra.gmra.mxu2 %v128_v50 }
  0x97   :  { %v125_v52 = vpop.f32.mrf.mxu1 }
  0x98   :  { %v126_v53 = vadd.f32 %v125_v52, %v81_v51 }
  0x9a   :  { %v129_v54 = vmax.f32 %v126_v53, 0.0 }
  0x9c   :  { %202 = vmatmul.f32.vlgmr.msra.gmra.mxu3 %v129_v54 }
 0x117   :  { %v183_v63 = vpop.f32.mrf.mxu2 }
 0x118   :  { %v184_v0 = vadd.f32 %v305_v62, %v183_v63 }
 0x11f   :  { %v203_v1 = vpop.f32.mrf.mxu3 }
 0x120   :  { %v204_v2 = vadd.f32 %v203_v1, %v184_v0 }
 0x122   :  { %v206_v3 = vmax.f32 %v204_v2, 0.0 }
 0x124   :  { %243 = vmatmul.f32.vlgmr.msra.gmra.mxu0 %v206_v3 }
 0x1a1   :  { %v244_v7 = vpop.f32.mrf.mxu0 }
 0x1a2   :  { %v245_v8 = vadd.f32 %v306_v6, %v244_v7 }
 0x1a4   :  { %v250_v9 = vsel %vm249_vm1, %v245_v8, 0.0 }
 0x1a5   :  { %v251_v10 = vmul.f32 %v250_v9, %v250_v9 }
 0x1a7   :  { %v252_v11 = vrot.slane %v251_v10, 4 }
 0x1a9   :  { %v253_v12 = vadd.f32 %v252_v11, %v251_v10 }
 0x1ab   :  { %v254_v13 = vrot.slane %v253_v12, 2 }
 0x1ad   :  { %v255_v14 = vadd.f32 %v254_v13, %v253_v12 }
 0x1af   :  { %v256_v15 = vrot.slane %v255_v14, 1 }
 0x1b1   :  { %v257_v16 = vadd.f32 %v256_v15, %v255_v14 }
 0x1b3   :  { %258 = vadd.xlane.f32.xlu0 %v257_v16 }
 0x226   :  { %v259_v17 = vpop.xlane.xlu0 %258 }
 0x227   :  { %307 = vrsqrt.f32 %v259_v17  ;;  %v272_v18 = vmax.f32 %v259_v17, 1e-30  ;;  %vm267_vm2 = vcmp.eq.f32.partialorder %v259_v17, inf  ;;  %v270_v30 = vand.u32 2147483648, %v259_v17 }
 0x228   :  { %vm269_vm3 = vcmp.eq.f32.partialorder %v259_v17, 0.0  ;;  %vm283_vm7 = vcmp.gt.f32.partialorder %v259_v17, 0.0 }
 0x229   :  { %309 = vrsqrt.f32 %v272_v18  ;;  %vm279_vm5 = vweird.f32 %v272_v18 }
 0x22d   :  { %v308_v19 = vpop.eup %307 }
 0x22e   :  { %v261_v20 = vmul.f32 %v308_v19, %v259_v17 }
 0x22f   :  { %v310_v21 = vpop.eup %309 }
 0x230   :  { %v262_v22 = vmul.f32 %v308_v19, %v261_v20  ;;  %v274_v23 = vmul.f32 %v310_v21, %v272_v18  ;;  %vm280_vm4 = vweird.f32 %v310_v21 }
 0x231   :  { %vm281_vm6 = vmor %vm279_vm5, %vm280_vm4 }
 0x232   :  { %v263_v24 = vmul.f32 0.5, %v262_v22  ;;  %v275_v26 = vmul.f32 %v310_v21, %v274_v23 }
 0x234   :  { %v264_v25 = vsub.f32 1.5, %v263_v24  ;;  %v276_v29 = vmul.f32 0.5, %v275_v26 }
 0x236   :  { %v265_v27 = vmul.f32 %v308_v19, %v264_v25  ;;  %v277_v33 = vsub.f32 1.5, %v276_v29 }
 0x238   :  { %v266_v28 = vmul.f32 %v265_v27, %v259_v17  ;;  %v278_v34 = vmul.f32 %v310_v21, %v277_v33 }
 0x23a   :  { %v268_v31 = vsel %vm267_vm2, %v259_v17, %v266_v28  ;;  %v282_v37 = vsel %vm281_vm6, %v310_v21, %v278_v34 }
 0x23b   :  { %v271_v32 = vsel %vm269_vm3, %v270_v30, %v268_v31 }
 0x23c   :  { %311 = vtanh.f32 %v271_v32 }
 0x242   :  { %v312_v35 = vpop.eup %311 }
 0x243   :  { %v285_v36 = vmul.f32 10.0, %v312_v35 }
 0x245   :  { %v286_v38 = vmul.f32 %v285_v36, %v282_v37 }
 0x247   :  { %v287_v39 = vsel %vm283_vm7, %v286_v38, 10.0 }
 0x248   :  { %v288_v40 = vmul.f32 %v287_v39, %v245_v8 }
 0x24a   :  { %289 = vst [vmem:[%s469_s7] sm:$0xff] %v288_v40 }
 0x24b   :  { %294 = vsyncpa [#allocation3], 1 }
 0x24c   :  { %295 = vsyncpa [#allocation5], 1 }

</bundles_post_ra>
